<compile_context>
chip_gen: v7x
topology: tpu7x:2x2x1
jax: 0.10.0
libtpu: 0.0.40
codegen_flags: <defaults>
</compile_context>

<pallas_src>
import jax
import jax.numpy as jnp
from jax.experimental import pallas as pl
from jax.experimental.pallas import tpu as pltpu


# ----------------------------- configuration --------------------------------
B, C, H, W = 2, 1, 16, 16          # small synthetic shapes
Z_DIM = 10
ACT_DIM = 5                        # action_encoder input dim (torch.zeros(1, 5))
ACT_PAD = 16                       # action lanes shipped to the kernel
ENC_HID = 64
ACT_HID = 32
ACT_OUT = 32
BOT_HID = 64
DEC_HID = 64
IN_DIM = C * H * W                 # 256
P = 128                            # lane width of the packed weight slab
assert IN_DIM % P == 0

# Row offsets / fan-in (K) of each sub-matrix inside the packed bf16 slab.
# Every offset and K is a multiple of 16 (bf16 sublane tile) -> relayout-free
# row slices.  K is the true fan-in rounded up to 16 ("dead K rows" pruned).
R_WE1, K_WE1 = 0, IN_DIM           # encoder L1:   256 -> 64
R_WE2, K_WE2 = 256, 64             # encoder L2:    64 -> 10
R_WA1, K_WA1 = 320, 16             # action  L1:     5 -> 32
R_WA2, K_WA2 = 336, 32             # action  L2:    32 -> 32
R_WB1H, K_WB1H = 368, 16           # bottleneck L1, h rows:      10 -> 64
R_WB1A, K_WB1A = 384, 32           # bottleneck L1, z_act rows:  32 -> 64
R_WB2, K_WB2 = 416, 64             # bottleneck L2: 64 -> 10
R_WD1, K_WD1 = 480, 16             # decoder L1:    10 -> 64
W128_ROWS = 496


# ------------------------------ Pallas kernel --------------------------------
def predictive_ae_kernel(xf_ref, act_ref, w128_ref, w256_ref, bias_ref,
                         xhat_ref, z_ref):
    """Encoder -> action-encoder -> bottleneck -> decoder, one batch tile.

    Weights are bf16 (in, out) slabs with pruned fan-in; activations are cast
    to bf16 right before each dot with f32 accumulation.  All output lane dims
    are 128-padded with zero weight columns / zero bias lanes, so padded lanes
    stay exactly zero through bias-add / ReLU and the next (lane-sliced) dot.
    """
    def mm(x_f32, row, k):
        return jnp.dot(x_f32.astype(jnp.bfloat16), w128_ref[row:row + k, :],
                       preferred_element_type=jnp.float32)

    def b(i):                                     # (1, 128) f32 bias row
        return bias_ref[i:i + 1, :P]

    xf = xf_ref[...]                              # (TM, IN_DIM) bf16
    act = act_ref[...]                            # (TM, 16) f32, lanes >= 5 are 0

    # --- encoder: h = Linear(ReLU(Linear(xf)))
    e1 = jnp.maximum(mm(xf, R_WE1, K_WE1) + b(0), 0.0)
    h = mm(e1[:, :K_WE2], R_WE2, K_WE2) + b(1)               # lanes >= 10 are 0

    # --- action encoder: z_act = Linear(ReLU(Linear(act)))
    a1 = jnp.maximum(mm(act, R_WA1, K_WA1) + b(2), 0.0)
    z_act = mm(a1[:, :K_WA2], R_WA2, K_WA2) + b(3)           # lanes >= 32 are 0

    # --- bottleneck on cat([h, z_act]): concat replaced by split (pruned-K) matmuls
    b1 = jnp.maximum(mm(h[:, :K_WB1H], R_WB1H, K_WB1H)
                     + mm(z_act[:, :K_WB1A], R_WB1A, K_WB1A)
                     + b(4), 0.0)
    z = mm(b1[:, :K_WB2], R_WB2, K_WB2) + b(5)               # lanes >= 10 are 0

    # --- decoder: x_hat = Linear(ReLU(Linear(z)))
    d1 = jnp.maximum(mm(z[:, :K_WD1], R_WD1, K_WD1) + b(6), 0.0)
    x_hat = jnp.dot(d1[:, :DEC_HID].astype(jnp.bfloat16), w256_ref[...],
                    preferred_element_type=jnp.float32) + bias_ref[7:8, :]
    # TODO(synk): apply sigmoid here if the original MLPDecoder uses one.

    xhat_ref[...] = x_hat.astype(xhat_ref.dtype)             # bf16 lane-dense
    z_ref[...] = z.astype(z_ref.dtype)                       # bf16 (TM, 128)


# ------------------------------ JAX wrapper -----------------------------------
def _round_up(n, m):
    return (n + m - 1) // m * m


def _pick_tile(b):
    """Batch tile: multiple of 16 (bf16 sublanes), <= 512, grid >= 2 when b allows."""
    if b <= 16:
        return _round_up(b, 16)
    return min(512, _round_up((b + 1) // 2, 16))


@jax.jit
def predictive_ae_forward(x, actions, packed):
    """Forward pass of PredictiveAE (cnn=False).

    Returns (x_hat, z, transformed) matching the PyTorch module:
      x_hat: (B, C, H, W) bf16; z: (B, Z_DIM) bf16; transformed: (B, C, H, W)
    """
    b = x.shape[0]
    # interact(x): deterministic surrogate (glue, not hot path).
    # TODO(synk): replace with the real interact() once available.
    transformed = jnp.roll(x, shift=1, axis=-1)

    tm = _pick_tile(b)
    b_pad = _round_up(b, tm)

    # bf16 activation input; pad only when needed (common case: no pad copy).
    xf = x.reshape(b, -1).astype(jnp.bfloat16)
    act = jnp.pad(actions.astype(jnp.float32),
                  ((0, 0), (0, ACT_PAD - ACT_DIM)))          # (b, 16), tiny
    if b_pad != b:
        xf = jnp.pad(xf, ((0, b_pad - b), (0, 0)))
        act = jnp.pad(act, ((0, b_pad - b), (0, 0)))

    x_hat_flat, z_pad = pl.pallas_call(
        predictive_ae_kernel,
        out_shape=(
            jax.ShapeDtypeStruct((b_pad, IN_DIM), jnp.bfloat16),
            jax.ShapeDtypeStruct((b_pad, P), jnp.bfloat16),
        ),
        grid=(b_pad // tm,),
        in_specs=[
            pl.BlockSpec((tm, IN_DIM), lambda i: (i, 0)),        # xf: batch-tiled bf16
            pl.BlockSpec((tm, ACT_PAD), lambda i: (i, 0)),       # actions: batch-tiled
            pl.BlockSpec((W128_ROWS, P), lambda i: (0, 0)),      # weight slab, resident
            pl.BlockSpec((DEC_HID, IN_DIM), lambda i: (0, 0)),   # decoder out matrix
            pl.BlockSpec((8, IN_DIM), lambda i: (0, 0)),         # bias slab (f32)
        ],
        out_specs=(
            pl.BlockSpec((tm, IN_DIM), lambda i: (i, 0)),
            pl.BlockSpec((tm, P), lambda i: (i, 0)),
        ),
        compiler_params=pltpu.CompilerParams(
            dimension_semantics=("parallel",)),   # shard batch tiles across v7x TCs
    )(xf, act, packed["w128"], packed["w256"], packed["bias"])

    if b_pad != b:
        x_hat_flat = x_hat_flat[:b]
        z_pad = z_pad[:b]
    x_hat = x_hat_flat.reshape(x.shape)
    z = z_pad[:, :Z_DIM]
    return x_hat, z, transformed


# ----------------------- parameter init & packing -----------------------------
def init_params(key):
    """Standard per-layer params, stored (in, out) = transposed nn.Linear."""
    def linear(key, fan_in, fan_out):
        kw, kb = jax.random.split(key)
        scale = 1.0 / jnp.sqrt(jnp.float32(fan_in))
        w = jax.random.uniform(kw, (fan_in, fan_out), jnp.float32, -scale, scale)
        b = jax.random.uniform(kb, (1, fan_out), jnp.float32, -scale, scale)
        return w, b

    keys = jax.random.split(key, 8)
    p = {}
    p["we1"], p["be1"] = linear(keys[0], IN_DIM, ENC_HID)          # encoder
    p["we2"], p["be2"] = linear(keys[1], ENC_HID, Z_DIM)
    p["wa1"], p["ba1"] = linear(keys[2], ACT_DIM, ACT_HID)         # action encoder
    p["wa2"], p["ba2"] = linear(keys[3], ACT_HID, ACT_OUT)
    p["wb1"], p["bb1"] = linear(keys[4], Z_DIM + ACT_OUT, BOT_HID)  # bottleneck
    p["wb2"], p["bb2"] = linear(keys[5], BOT_HID, Z_DIM)
    p["wd1"], p["bd1"] = linear(keys[6], Z_DIM, DEC_HID)           # decoder
    p["wd2"], p["bd2"] = linear(keys[7], DEC_HID, IN_DIM)
    return p


def pack_params(p):
    """Pack the 16 tensors into 3 pruned, tile-aligned slabs (done once)."""
    def put(slab, row, w):
        return slab.at[row:row + w.shape[0], :w.shape[1]].set(w)

    w128 = jnp.zeros((W128_ROWS, P), jnp.float32)
    w128 = put(w128, R_WE1, p["we1"])               # (256, 64)
    w128 = put(w128, R_WE2, p["we2"])               # (64, 10)
    w128 = put(w128, R_WA1, p["wa1"])               # (5, 32)
    w128 = put(w128, R_WA2, p["wa2"])               # (32, 32)
    w128 = put(w128, R_WB1H, p["wb1"][:Z_DIM])      # (10, 64) rows acting on h
    w128 = put(w128, R_WB1A, p["wb1"][Z_DIM:])      # (32, 64) rows acting on z_act
    w128 = put(w128, R_WB2, p["wb2"])               # (64, 10)
    w128 = put(w128, R_WD1, p["wd1"])               # (10, 64)

    w256 = p["wd2"]                                 # (64, 256), no padding needed

    bias = jnp.zeros((8, IN_DIM), jnp.float32)
    for i, k in enumerate(["be1", "be2", "ba1", "ba2", "bb1", "bb2", "bd1", "bd2"]):
        bias = bias.at[i, :p[k].shape[1]].set(p[k][0])

    return {"w128": w128.astype(jnp.bfloat16),
            "w256": w256.astype(jnp.bfloat16),
            "bias": bias}


# --------------------------- pure-JAX reference --------------------------------
def _reference_forward(x, actions, p):
    xf = x.reshape(x.shape[0], -1).astype(jnp.float32)
    e1 = jnp.maximum(xf @ p["we1"] + p["be1"], 0.0)
    h = e1 @ p["we2"] + p["be2"]
    a1 = jnp.maximum(actions @ p["wa1"] + p["ba1"], 0.0)
    z_act = a1 @ p["wa2"] + p["ba2"]
    cat = jnp.concatenate([h, z_act], axis=1)
    b1 = jnp.maximum(cat @ p["wb1"] + p["bb1"], 0.0)
    z = b1 @ p["wb2"] + p["bb2"]
    d1 = jnp.maximum(z @ p["wd1"] + p["bd1"], 0.0)
    x_hat = (d1 @ p["wd2"] + p["bd2"]).reshape(x.shape)
    return x_hat, z


# ----------------------------------- main --------------------------------------
if __name__ == "__main__":
    key = jax.random.PRNGKey(0)
    kx, kp = jax.random.split(key)

    x = jax.random.normal(kx, (B, C, H, W), jnp.float32)     # NCHW, like PyTorch
    # deterministic 5-dim action vector per batch element (interact() surrogate)
    actions = jnp.tile(jnp.array([[0.0, 1.0, 0.0, 0.0, 1.0]], jnp.float32), (B, 1))

    params = init_params(kp)
    packed = pack_params(params)

    x_hat, z, transformed = predictive_ae_forward(x, actions, packed)
    jax.block_until_ready((x_hat, z, transformed))

    assert x_hat.shape == (B, C, H, W), x_hat.shape
    assert z.shape == (B, Z_DIM), z.shape
    assert transformed.shape == (B, C, H, W), transformed.shape
    assert jnp.all(jnp.isfinite(x_hat.astype(jnp.float32)))
    assert jnp.all(jnp.isfinite(z.astype(jnp.float32)))

    # Validate lane padding / slab pruning / concat-split against f32 reference
    # (loose tolerance for bf16 weights, bf16 matmul inputs and bf16 I/O).
    x_hat_ref, z_ref = _reference_forward(x, actions, params)
    assert jnp.allclose(x_hat.astype(jnp.float32), x_hat_ref, rtol=5e-2, atol=5e-2)
    assert jnp.allclose(z.astype(jnp.float32), z_ref, rtol=5e-2, atol=5e-2)

    print("KERNEL_OK")
</pallas_src>

<mosaic_0001>
module attributes {stable_mosaic.version = 11 : i64} {
  func.func @predictive_ae_kernel(%arg0: i32, %arg1: memref<16x256xbf16, #tpu.memory_space<vmem>>, %arg2: memref<16x16xf32, #tpu.memory_space<vmem>>, %arg3: memref<496x128xbf16, #tpu.memory_space<vmem>>, %arg4: memref<64x256xbf16, #tpu.memory_space<vmem>>, %arg5: memref<8x256xf32, #tpu.memory_space<vmem>>, %arg6: memref<16x256xbf16, #tpu.memory_space<vmem>>, %arg7: memref<16x128xbf16, #tpu.memory_space<vmem>>) attributes {dimension_semantics = [#tpu.dimension_semantics<parallel>], iteration_bounds = array<i64: 1>, scalar_prefetch = 0 : i64, scratch_operands = 0 : i64, tpu.core_type = #tpu.core_type<tc>, window_params = [{transform_indices = @transform_0, window_bounds = array<i64: 16, 256>}, {transform_indices = @transform_1, window_bounds = array<i64: 16, 16>}, {pipeline_mode = #tpu.pipeline_mode<synchronous>, transform_indices = @transform_2, window_bounds = array<i64: 496, 128>}, {pipeline_mode = #tpu.pipeline_mode<synchronous>, transform_indices = @transform_3, window_bounds = array<i64: 64, 256>}, {pipeline_mode = #tpu.pipeline_mode<synchronous>, transform_indices = @transform_4, window_bounds = array<i64: 8, 256>}, {transform_indices = @transform_5, window_bounds = array<i64: 16, 256>}, {transform_indices = @transform_6, window_bounds = array<i64: 16, 128>}]} {
    %c0 = arith.constant 0 : index
    %c0_0 = arith.constant 0 : index
    %0 = vector.load %arg1[%c0, %c0_0] : memref<16x256xbf16, #tpu.memory_space<vmem>>, vector<16x256xbf16>
    %c0_1 = arith.constant 0 : index
    %c0_2 = arith.constant 0 : index
    %1 = vector.load %arg2[%c0_1, %c0_2] : memref<16x16xf32, #tpu.memory_space<vmem>>, vector<16x16xf32>
    %c0_3 = arith.constant 0 : index
    %c0_4 = arith.constant 0 : index
    %2 = vector.load %arg3[%c0_3, %c0_4] : memref<496x128xbf16, #tpu.memory_space<vmem>>, vector<256x128xbf16>
    %cst = arith.constant dense<0.000000e+00> : vector<16x128xf32>
    %3 = tpu.matmul %0, %2, %cst {dimension_numbers = #tpu.dot_dimension_numbers<[1], [0], [0], [1], [0, 0, 1, 1], [], []>} : vector<16x256xbf16>, vector<256x128xbf16>, vector<16x128xf32> -> vector<16x128xf32>
    %c0_5 = arith.constant 0 : index
    %c0_6 = arith.constant 0 : index
    %4 = vector.load %arg5[%c0_5, %c0_6] : memref<8x256xf32, #tpu.memory_space<vmem>>, vector<1x128xf32>
    %5 = vector.broadcast %4 : vector<1x128xf32> to vector<16x128xf32>
    %6 = arith.addf %3, %5 : vector<16x128xf32>
    %cst_7 = arith.constant 0.000000e+00 : f32
    %7 = vector.broadcast %cst_7 : f32 to vector<16x128xf32>
    %8 = arith.maximumf %6, %7 : vector<16x128xf32>
    %9 = vector.extract_strided_slice %8 {offsets = [0, 0], sizes = [16, 64], strides = [1, 1]} : vector<16x128xf32> to vector<16x64xf32>
    %10 = arith.truncf %9 : vector<16x64xf32> to vector<16x64xbf16>
    %c256 = arith.constant 256 : index
    %c0_8 = arith.constant 0 : index
    %11 = vector.load %arg3[%c256, %c0_8] : memref<496x128xbf16, #tpu.memory_space<vmem>>, vector<64x128xbf16>
    %cst_9 = arith.constant dense<0.000000e+00> : vector<16x128xf32>
    %12 = tpu.matmul %10, %11, %cst_9 {dimension_numbers = #tpu.dot_dimension_numbers<[1], [0], [0], [1], [0, 0, 1, 1], [], []>} : vector<16x64xbf16>, vector<64x128xbf16>, vector<16x128xf32> -> vector<16x128xf32>
    %c1 = arith.constant 1 : index
    %c0_10 = arith.constant 0 : index
    %13 = vector.load %arg5[%c1, %c0_10] : memref<8x256xf32, #tpu.memory_space<vmem>>, vector<1x128xf32>
    %14 = vector.broadcast %13 : vector<1x128xf32> to vector<16x128xf32>
    %15 = arith.addf %12, %14 : vector<16x128xf32>
    %16 = arith.truncf %1 : vector<16x16xf32> to vector<16x16xbf16>
    %c320 = arith.constant 320 : index
    %c0_11 = arith.constant 0 : index
    %17 = vector.load %arg3[%c320, %c0_11] : memref<496x128xbf16, #tpu.memory_space<vmem>>, vector<16x128xbf16>
    %cst_12 = arith.constant dense<0.000000e+00> : vector<16x128xf32>
    %18 = tpu.matmul %16, %17, %cst_12 {dimension_numbers = #tpu.dot_dimension_numbers<[1], [0], [0], [1], [0, 0, 1, 1], [], []>} : vector<16x16xbf16>, vector<16x128xbf16>, vector<16x128xf32> -> vector<16x128xf32>
    %c2 = arith.constant 2 : index
    %c0_13 = arith.constant 0 : index
    %19 = vector.load %arg5[%c2, %c0_13] : memref<8x256xf32, #tpu.memory_space<vmem>>, vector<1x128xf32>
    %20 = vector.broadcast %19 : vector<1x128xf32> to vector<16x128xf32>
    %21 = arith.addf %18, %20 : vector<16x128xf32>
    %cst_14 = arith.constant 0.000000e+00 : f32
    %22 = vector.broadcast %cst_14 : f32 to vector<16x128xf32>
    %23 = arith.maximumf %21, %22 : vector<16x128xf32>
    %24 = vector.extract_strided_slice %23 {offsets = [0, 0], sizes = [16, 32], strides = [1, 1]} : vector<16x128xf32> to vector<16x32xf32>
    %25 = arith.truncf %24 : vector<16x32xf32> to vector<16x32xbf16>
    %c336 = arith.constant 336 : index
    %c0_15 = arith.constant 0 : index
    %26 = vector.load %arg3[%c336, %c0_15] : memref<496x128xbf16, #tpu.memory_space<vmem>>, vector<32x128xbf16>
    %cst_16 = arith.constant dense<0.000000e+00> : vector<16x128xf32>
    %27 = tpu.matmul %25, %26, %cst_16 {dimension_numbers = #tpu.dot_dimension_numbers<[1], [0], [0], [1], [0, 0, 1, 1], [], []>} : vector<16x32xbf16>, vector<32x128xbf16>, vector<16x128xf32> -> vector<16x128xf32>
    %c3 = arith.constant 3 : index
    %c0_17 = arith.constant 0 : index
    %28 = vector.load %arg5[%c3, %c0_17] : memref<8x256xf32, #tpu.memory_space<vmem>>, vector<1x128xf32>
    %29 = vector.broadcast %28 : vector<1x128xf32> to vector<16x128xf32>
    %30 = arith.addf %27, %29 : vector<16x128xf32>
    %31 = vector.extract_strided_slice %15 {offsets = [0, 0], sizes = [16, 16], strides = [1, 1]} : vector<16x128xf32> to vector<16x16xf32>
    %32 = arith.truncf %31 : vector<16x16xf32> to vector<16x16xbf16>
    %c368 = arith.constant 368 : index
    %c0_18 = arith.constant 0 : index
    %33 = vector.load %arg3[%c368, %c0_18] : memref<496x128xbf16, #tpu.memory_space<vmem>>, vector<16x128xbf16>
    %cst_19 = arith.constant dense<0.000000e+00> : vector<16x128xf32>
    %34 = tpu.matmul %32, %33, %cst_19 {dimension_numbers = #tpu.dot_dimension_numbers<[1], [0], [0], [1], [0, 0, 1, 1], [], []>} : vector<16x16xbf16>, vector<16x128xbf16>, vector<16x128xf32> -> vector<16x128xf32>
    %35 = vector.extract_strided_slice %30 {offsets = [0, 0], sizes = [16, 32], strides = [1, 1]} : vector<16x128xf32> to vector<16x32xf32>
    %36 = arith.truncf %35 : vector<16x32xf32> to vector<16x32xbf16>
    %c384 = arith.constant 384 : index
    %c0_20 = arith.constant 0 : index
    %37 = vector.load %arg3[%c384, %c0_20] : memref<496x128xbf16, #tpu.memory_space<vmem>>, vector<32x128xbf16>
    %cst_21 = arith.constant dense<0.000000e+00> : vector<16x128xf32>
    %38 = tpu.matmul %36, %37, %cst_21 {dimension_numbers = #tpu.dot_dimension_numbers<[1], [0], [0], [1], [0, 0, 1, 1], [], []>} : vector<16x32xbf16>, vector<32x128xbf16>, vector<16x128xf32> -> vector<16x128xf32>
    %39 = arith.addf %34, %38 : vector<16x128xf32>
    %c4 = arith.constant 4 : index
    %c0_22 = arith.constant 0 : index
    %40 = vector.load %arg5[%c4, %c0_22] : memref<8x256xf32, #tpu.memory_space<vmem>>, vector<1x128xf32>
    %41 = vector.broadcast %40 : vector<1x128xf32> to vector<16x128xf32>
    %42 = arith.addf %39, %41 : vector<16x128xf32>
    %cst_23 = arith.constant 0.000000e+00 : f32
    %43 = vector.broadcast %cst_23 : f32 to vector<16x128xf32>
    %44 = arith.maximumf %42, %43 : vector<16x128xf32>
    %45 = vector.extract_strided_slice %44 {offsets = [0, 0], sizes = [16, 64], strides = [1, 1]} : vector<16x128xf32> to vector<16x64xf32>
    %46 = arith.truncf %45 : vector<16x64xf32> to vector<16x64xbf16>
    %c416 = arith.constant 416 : index
    %c0_24 = arith.constant 0 : index
    %47 = vector.load %arg3[%c416, %c0_24] : memref<496x128xbf16, #tpu.memory_space<vmem>>, vector<64x128xbf16>
    %cst_25 = arith.constant dense<0.000000e+00> : vector<16x128xf32>
    %48 = tpu.matmul %46, %47, %cst_25 {dimension_numbers = #tpu.dot_dimension_numbers<[1], [0], [0], [1], [0, 0, 1, 1], [], []>} : vector<16x64xbf16>, vector<64x128xbf16>, vector<16x128xf32> -> vector<16x128xf32>
    %c5 = arith.constant 5 : index
    %c0_26 = arith.constant 0 : index
    %49 = vector.load %arg5[%c5, %c0_26] : memref<8x256xf32, #tpu.memory_space<vmem>>, vector<1x128xf32>
    %50 = vector.broadcast %49 : vector<1x128xf32> to vector<16x128xf32>
    %51 = arith.addf %48, %50 : vector<16x128xf32>
    %52 = vector.extract_strided_slice %51 {offsets = [0, 0], sizes = [16, 16], strides = [1, 1]} : vector<16x128xf32> to vector<16x16xf32>
    %53 = arith.truncf %52 : vector<16x16xf32> to vector<16x16xbf16>
    %c480 = arith.constant 480 : index
    %c0_27 = arith.constant 0 : index
    %54 = vector.load %arg3[%c480, %c0_27] : memref<496x128xbf16, #tpu.memory_space<vmem>>, vector<16x128xbf16>
    %cst_28 = arith.constant dense<0.000000e+00> : vector<16x128xf32>
    %55 = tpu.matmul %53, %54, %cst_28 {dimension_numbers = #tpu.dot_dimension_numbers<[1], [0], [0], [1], [0, 0, 1, 1], [], []>} : vector<16x16xbf16>, vector<16x128xbf16>, vector<16x128xf32> -> vector<16x128xf32>
    %c6 = arith.constant 6 : index
    %c0_29 = arith.constant 0 : index
    %56 = vector.load %arg5[%c6, %c0_29] : memref<8x256xf32, #tpu.memory_space<vmem>>, vector<1x128xf32>
    %57 = vector.broadcast %56 : vector<1x128xf32> to vector<16x128xf32>
    %58 = arith.addf %55, %57 : vector<16x128xf32>
    %cst_30 = arith.constant 0.000000e+00 : f32
    %59 = vector.broadcast %cst_30 : f32 to vector<16x128xf32>
    %60 = arith.maximumf %58, %59 : vector<16x128xf32>
    %61 = vector.extract_strided_slice %60 {offsets = [0, 0], sizes = [16, 64], strides = [1, 1]} : vector<16x128xf32> to vector<16x64xf32>
    %62 = arith.truncf %61 : vector<16x64xf32> to vector<16x64xbf16>
    %c0_31 = arith.constant 0 : index
    %c0_32 = arith.constant 0 : index
    %63 = vector.load %arg4[%c0_31, %c0_32] : memref<64x256xbf16, #tpu.memory_space<vmem>>, vector<64x256xbf16>
    %cst_33 = arith.constant dense<0.000000e+00> : vector<16x256xf32>
    %64 = tpu.matmul %62, %63, %cst_33 {dimension_numbers = #tpu.dot_dimension_numbers<[1], [0], [0], [1], [0, 0, 1, 1], [], []>} : vector<16x64xbf16>, vector<64x256xbf16>, vector<16x256xf32> -> vector<16x256xf32>
    %c7 = arith.constant 7 : index
    %c0_34 = arith.constant 0 : index
    %65 = vector.load %arg5[%c7, %c0_34] : memref<8x256xf32, #tpu.memory_space<vmem>>, vector<1x256xf32>
    %66 = vector.broadcast %65 : vector<1x256xf32> to vector<16x256xf32>
    %67 = arith.addf %64, %66 : vector<16x256xf32>
    %68 = arith.truncf %67 : vector<16x256xf32> to vector<16x256xbf16>
    %c0_35 = arith.constant 0 : index
    %c0_36 = arith.constant 0 : index
    %69 = vector.load %arg6[%c0_35, %c0_36] : memref<16x256xbf16, #tpu.memory_space<vmem>>, vector<16x256xbf16>
    tpu.vector_store %arg6[%c0_35, %c0_36], %68 {strides = array<i32>} : memref<16x256xbf16, #tpu.memory_space<vmem>>, vector<16x256xbf16>,
    %70 = arith.truncf %51 : vector<16x128xf32> to vector<16x128xbf16>
    %c0_37 = arith.constant 0 : index
    %c0_38 = arith.constant 0 : index
    %71 = vector.load %arg7[%c0_37, %c0_38] : memref<16x128xbf16, #tpu.memory_space<vmem>>, vector<16x128xbf16>
    tpu.vector_store %arg7[%c0_37, %c0_38], %70 {strides = array<i32>} : memref<16x128xbf16, #tpu.memory_space<vmem>>, vector<16x128xbf16>,
    return
  }
  func.func @transform_0(%arg0: i32) -> (i32, i32) {
    %c0_i32 = arith.constant 0 : i32
    %c0_i32_0 = arith.constant 0 : i32
    return %arg0, %c0_i32 : i32, i32
  }
  func.func @transform_1(%arg0: i32) -> (i32, i32) {
    %c0_i32 = arith.constant 0 : i32
    %c0_i32_0 = arith.constant 0 : i32
    return %arg0, %c0_i32 : i32, i32
  }
  func.func @transform_2(%arg0: i32) -> (i32, i32) {
    %c0_i32 = arith.constant 0 : i32
    %c0_i32_0 = arith.constant 0 : i32
    %c0_i32_1 = arith.constant 0 : i32
    return %c0_i32, %c0_i32_0 : i32, i32
  }
  func.func @transform_3(%arg0: i32) -> (i32, i32) {
    %c0_i32 = arith.constant 0 : i32
    %c0_i32_0 = arith.constant 0 : i32
    %c0_i32_1 = arith.constant 0 : i32
    return %c0_i32, %c0_i32_0 : i32, i32
  }
  func.func @transform_4(%arg0: i32) -> (i32, i32) {
    %c0_i32 = arith.constant 0 : i32
    %c0_i32_0 = arith.constant 0 : i32
    %c0_i32_1 = arith.constant 0 : i32
    return %c0_i32, %c0_i32_0 : i32, i32
  }
  func.func @transform_5(%arg0: i32) -> (i32, i32) {
    %c0_i32 = arith.constant 0 : i32
    %c0_i32_0 = arith.constant 0 : i32
    return %arg0, %c0_i32 : i32, i32
  }
  func.func @transform_6(%arg0: i32) -> (i32, i32) {
    %c0_i32 = arith.constant 0 : i32
    %c0_i32_0 = arith.constant 0 : i32
    return %arg0, %c0_i32 : i32, i32
  }
}

</mosaic_0001>

<bundles_post_ra>
// kernel: predictive_ae_forward.1
= control target key start
LH: loop header
LB: loop body
LE: loop exit
PB: predicated region body
PF: predicated region fallthrough
CT: control target
= control target key end

     0   :  { %12 = vsyncpa [#allocation3], 0  ;;  %s1056_s21 = smov [#allocation2]   ;;  %s1215_s0 = inlined_call_operand.vmem [shape: bf16[16,256], index: 0, kind: input, shape index: {}]   ;;  %s1216_s1 = inlined_call_operand.vmem [shape: f32[16,16], index: 1, kind: input, shape index: {}]   ;;  %s1217_s2 = inlined_call_operand.hbm [shape: bf16[496,128], index: 2, kind: input, shape index: {}]   ;;  %s1218_s3 = inlined_call_operand.vmem [shape: bf16[64,256], index: 3, kind: input, shape index: {}]   ;;  %s1219_s4 = inlined_call_operand.vmem [shape: f32[8,256], index: 4, kind: input, shape index: {}]   ;;  %s1220_s5 = inlined_call_operand.vmem [shape: bf16[16,256], index: 5, kind: output, shape index: {0}]   ;;  %s1221_s6 = inlined_call_operand.vmem [shape: bf16[16,128], index: 6, kind: output, shape index: {1}]  }
   0x1   :  { %s22_s22 = sshll.u32 %s1056_s21, 4  ;;  %s1032_s25 = scalar_lea.hbm %s1217_s2, 3968  ;;  %s23_s22 = int_to_ptr.vmem [resolvable:$true] %s22_s22 }
   0x2   :  { %p1033_p0 = scmp.ne.s32.totalorder %s1217_s2, %s1032_s25  ;;  %p1036_p1 = scmp.lt.u32.totalorder %s1032_s25, %s1217_s2 }
   0x4   :  { %p1038_p2 = pnand %p1036_p1, %p1033_p0 }
   0x6   :  { %1041 = shalt.err (!%p1038_p2)
}
   0x7   :  { %s1042_s30 = scalar_lea.vmem %s23_s22, 3968  ;;  %p1047_p4 = scmp.lt.s32.totalorder %s23_s22, %s23_s22 }
   0x8   :  { %p1043_p3 = scmp.ne.s32.totalorder %s23_s22, %s1042_s30  ;;  %p1048_p5 = scmp.lt.s32.totalorder %s1042_s30, %s1042_s30 }
   0xa   :  { %p1049_p6 = por %p1048_p5, %p1047_p4 }
   0xc   :  { %p1050_p7 = pnand %p1049_p6, %p1043_p3 }
   0xe   :  { %1053 = shalt.err (!%p1050_p7)
}
   0xf   :  { %s1057_s7 = smov 64   ;;  %s1058_s8 = smov 4  }
  0x10   :  { %28 = dma.hbm_to_vmem [thread:$0]  %s1217_s2, 3968, %s23_s22, [#allocation3], %s1057_s7, %s1057_s7, %s1058_s8  }
  0x11   :  { %1054 = dma.done.wait [#allocation3], 3968  }
  0x12   :  { %1055 = vsyncadd [#allocation3], 4294963328  ;;  %v1059_v0 = vmov 0.0   ;;  %v986_v1 = vld [vmem:[#allocation2 + $0x40] sm:$0xff]   ;;  %v988_v3 = vld [vmem:[#allocation2 + $0x48] sm:$0xff]   ;;  %vm1060_vm0 = vmmov 0  }
  0x13   :  { %922 = vmatprep.subr.bf16.mxu1 %v1059_v0  ;;  %v987_v2 = vld [vmem:[#allocation2] sm:$0xff]   ;;  %878 = vmatprep.subr.bf16.mxu0 %v986_v1  ;;  %v989_v4 = vld [vmem:[#allocation2 + $0x8] sm:$0xff]   ;;  %v990_v5 = vld [vmem:[#allocation2 + $0x50] sm:$0xff]   ;;  %vm257_vm1 = vcmask 523264   ;;  %vm312_vm2 = vcmask 130048   ;;  %vm377_vm3 = vcmask 261120  }
  0x14   :  { %879 = vmatpush3.bf16.msra.mxu0 %v987_v2  ;;  %v991_v6 = vld [vmem:[#allocation2 + $0x10] sm:$0xff]   ;;  %v992_v7 = vld [vmem:[#allocation2 + $0x58] sm:$0xff]   ;;  %v994_v9 = vld [vmem:[#allocation2 + $0x60] sm:$0xff]   ;;  %930 = vmatprep.mubr.msk.bf16.mxu1 %vm1060_vm0, %v1059_v0 }
  0x15   :  { %880 = vmatprep.subr.bf16.mxu0 %v988_v3  ;;  %v993_v8 = vld [vmem:[#allocation2 + $0x18] sm:$0xff]   ;;  %v995_v10 = vld [vmem:[#allocation2 + $0x20] sm:$0xff]   ;;  %v996_v11 = vld [vmem:[#allocation2 + $0x68] sm:$0xff]  }
  0x16   :  { %v997_v12 = vld [vmem:[#allocation2 + $0x28] sm:$0xff]   ;;  %v998_v14 = vld [vmem:[#allocation2 + $0x70] sm:$0xff]   ;;  %v1005_v15 = vld [vmem:[#allocation2 + $0x80] sm:$0xff]  }
  0x17   :  { %v1004_v13 = vld [vmem:[%s1215_s0 + $0x4] ss:$8 sps:$4 sm:$0xff]   ;;  %923 = vmatpush3.bf16.msra.mxu1 %v1005_v15  ;;  %v999_v16 = vld [vmem:[#allocation2 + $0x30] sm:$0xff]   ;;  %v1000_v17 = vld [vmem:[#allocation2 + $0x78] sm:$0xff]  }
  0x18   :  { %881 = vmatpush3.bf16.msra.mxu0 %v989_v4  ;;  %212 = vmatprep.mubr.bf16.mxu0 %v1004_v13  ;;  %v1001_v18 = vld [vmem:[#allocation2 + $0x38] sm:$0xff]   ;;  %v1002_v19 = vld [vmem:[%s1215_s0] ss:$8 sps:$4 sm:$0xff]   ;;  %v1007_v21 = vld [vmem:[#allocation2 + $0x90] sm:$0xff]  }
  0x19   :  { %882 = vmatprep.subr.bf16.mxu0 %v990_v5  ;;  %924 = vmatprep.subr.bf16.mxu1 %v1059_v0  ;;  %v1006_v20 = vld [vmem:[#allocation2 + $0x88] sm:$0xff]   ;;  %v1008_v22 = vld [vmem:[#allocation2 + $0x98] sm:$0xff]   ;;  %v73_v24 = vld [vmem:[%s1219_s4] ss:$0 sm:$0xff] }
  0x1a   :  { %v1009_v34 = vld [vmem:[#allocation2 + $0xa0] sm:$0xff]   ;;  %v40_v37 = vld [vmem:[%s1216_s1 + $0x8] sm:$0xff]  ;;  %v1011_v40 = vld [vmem:[#allocation2 + $0xb0] sm:$0xff]  }
  0x1b   :  { %925 = vmatpush3.bf16.msra.mxu1 %v1006_v20  ;;  %v39_v36 = vld [vmem:[%s1216_s1] sm:$0xff]  ;;  %v1010_v39 = vld [vmem:[#allocation2 + $0xa8] sm:$0xff]   ;;  %v1012_v59 = vld [vmem:[#allocation2 + $0xb8] sm:$0xff]  }
  0x1c   :  { %883 = vmatpush3.bf16.msra.mxu0 %v991_v6  ;;  %926 = vmatprep.subr.bf16.mxu1 %v1059_v0  ;;  %v302_v38 = vpack.c.bf16 %v40_v37, %v39_v36  ;;  %v1013_v41 = vld [vmem:[#allocation2 + $0xc0] sm:$0xff]   ;;  %v1014_v61 = vld [vmem:[#allocation2 + $0xc8] sm:$0xff]   ;;  %v1015_v6 = vld [vmem:[#allocation2 + $0xd0] sm:$0xff]  }
  0x1d   :  { %884 = vmatprep.subr.bf16.mxu0 %v992_v7  ;;  %v232_v42 = vld [vmem:[%s1219_s4 + $0x1] ss:$0 sm:$0xff]  ;;  %v305_v50 = vld [vmem:[%s1219_s4 + $0x2] ss:$0 sm:$0xff]  ;;  %v364_v62 = vld [vmem:[%s1219_s4 + $0x3] ss:$0 sm:$0xff] }
  0x1e   :  { %v1017_v13 = vld [vmem:[#allocation2 + $0xe0] sm:$0xff]   ;;  %v1019_v15 = vld [vmem:[#allocation2 + $0xf0] sm:$0xff]  }
  0x1f   :  { %927 = vmatpush3.bf16.msra.mxu1 %v1007_v21  ;;  %v1025_v37 = vld [vmem:[%s1218_s3 + $0x14] ss:$8 sps:$4 sm:$0xff]  }
  0x20   :  { %885 = vmatpush3.bf16.msra.mxu0 %v993_v8  ;;  %928 = vmatprep.subr.bf16.mxu1 %v1059_v0 }
  0x21   :  { %886 = vmatprep.subr.bf16.mxu0 %v994_v9 }
  0x23   :  { %929 = vmatpush3.bf16.msra.mxu1 %v1008_v22 }
  0x24   :  { %887 = vmatpush3.bf16.msra.mxu0 %v995_v10  ;;  %934 = vmatprep.subr.bf16.mxu1 %v1059_v0 }
  0x25   :  { %888 = vmatprep.subr.bf16.mxu0 %v996_v11 }
  0x28   :  { %889 = vmatpush3.bf16.msra.mxu0 %v997_v12  ;;  %v1016_v12 = vld [vmem:[#allocation2 + $0xd8] sm:$0xff]  }
  0x29   :  { %890 = vmatprep.subr.bf16.mxu0 %v998_v14  ;;  %v1018_v14 = vld [vmem:[#allocation2 + $0xe8] sm:$0xff]  }
  0x2c   :  { %891 = vmatpush3.bf16.msra.mxu0 %v999_v16 }
  0x2d   :  { %892 = vmatprep.subr.bf16.mxu0 %v1000_v17  ;;  %v536_v17 = vld [vmem:[%s1219_s4 + $0x4] ss:$0 sm:$0xff] }
  0x30   :  { %893 = vmatpush3.bf16.msra.mxu0 %v1001_v18 }
  0x31   :  { %948 = vmatprep.subr.bf16.mxu0 %v1059_v0 }
  0x33   :  { %213 = vmatmul.mubr.bf16.vlgmr.msra.gmra.mrb[0].mxu0 %v1002_v19 }
  0x34   :  { %952 = vmatprep.mubr.msk.bf16.mxu0 %vm1060_vm0, %v1059_v0  ;;  %949 = vmatpush3.bf16.msra.mxu0 %v1013_v41  ;;  %v1031_v41 = vld [vmem:[%s1218_s3 + $0x34] ss:$8 sps:$4 sm:$0xff]  }
  0x35   :  { %950 = vmatprep.subr.bf16.mxu0 %v1059_v0 }
  0x38   :  { %951 = vmatpush3.bf16.msra.mxu0 %v1014_v61 }
  0x39   :  { %962 = vmatprep.subr.bf16.mxu0 %v1059_v0 }
 0x106   :  { %v894_v23 = vpop.f32.mrb[0].mxu0 }
 0x107   :  { %v895_v25 = vpop.f32.mrb[1].mxu0 }
 0x108   :  { %v896_v26 = vadd.f32 %v895_v25, %v894_v23  ;;  %v897_v27 = vpop.f32.mrb[2].mxu0 }
 0x109   :  { %v898_v28 = vpop.f32.mrb[3].mxu0 }
 0x10a   :  { %v215_v29 = vadd.f32 %v896_v26, %v73_v24  ;;  %v899_v30 = vadd.f32 %v898_v28, %v897_v27  ;;  %v550_v28 = vld [vmem:[%s1219_s4 + $0x5] ss:$0 sm:$0xff] }
 0x10c   :  { %v218_v31 = vadd.f32 %v899_v30, %v73_v24  ;;  %v221_v32 = vmax.f32 %v215_v29, 0.0 }
 0x10e   :  { %v222_v33 = vmax.f32 %v218_v31, 0.0 }
 0x110   :  { %v223_v35 = vpack.c.bf16 %v222_v33, %v221_v32 }
 0x112   :  { %931 = vmatmul.mubr.msk.bf16.vlgmr.msra.gmra.mrb[0].mxu1 %vm257_vm1, %v223_v35  ;;  %v1020_v35 = vld [vmem:[%s1218_s3] ss:$8 sps:$4 sm:$0xff]  }
 0x113   :  { %935 = vmatpush3.bf16.msra.mxu1 %v1009_v34  ;;  %936 = vmatprep.mubr.msk.bf16.mxu1 %vm1060_vm0, %v1059_v0 }
 0x114   :  { %940 = vmatprep.subr.bf16.mxu1 %v1059_v0 }
 0x11a   :  { %937 = vmatmul.mubr.msk.bf16.vlgmr.msra.gmra.mrb[4].mxu1 %vm312_vm2, %v302_v38  ;;  %v1023_v38 = vld [vmem:[%s1218_s3 + $0x10] ss:$8 sps:$4 sm:$0xff]  }
 0x11b   :  { %944 = vmatprep.mubr.msk.bf16.mxu1 %vm1060_vm0, %v1059_v0  ;;  %941 = vmatpush3.bf16.msra.mxu1 %v1010_v39  ;;  %v1028_v39 = vld [vmem:[%s1218_s3 + $0x24] ss:$8 sps:$4 sm:$0xff]  }
 0x11c   :  { %942 = vmatprep.subr.bf16.mxu1 %v1059_v0 }
 0x11f   :  { %943 = vmatpush3.bf16.msra.mxu1 %v1011_v40  ;;  %v1026_v40 = vld [vmem:[%s1218_s3 + $0x20] ss:$8 sps:$4 sm:$0xff]  }
 0x120   :  { %956 = vmatprep.subr.bf16.mxu1 %v1059_v0 }
 0x1e5   :  { %v295_v43 = vpop.f32.mrb[0].mxu1 }
 0x1e6   :  { %v932_v44 = vpop.f32.mrb[1].mxu1  ;;  %v296_v46 = vadd.f32 %v295_v43, %v232_v42  ;;  %v1061_v43 = vmov 0  }
 0x1e7   :  { %v298_v45 = vpop.f32.mrb[2].mxu1  ;;  %v622_v44 = vld [vmem:[%s1219_s4 + $0x6] ss:$0 sm:$0xff] }
 0x1e8   :  { %v299_v47 = vadd.f32 %v298_v45, %v232_v42  ;;  %v933_v48 = vpop.f32.mrb[3].mxu1  ;;  %v1029_v42 = vld [vmem:[%s1218_s3 + $0x30] ss:$8 sps:$4 sm:$0xff]  }
 0x1ea   :  { %v422_v49 = vpack.c.bf16 %v299_v47, %v296_v46 }
 0x1ed   :  { %v350_v51 = vpop.f32.mrb[4].mxu1 }
 0x1ee   :  { %v351_v52 = vadd.f32 %v350_v51, %v305_v50  ;;  %v938_v53 = vpop.f32.mrb[5].mxu1 }
 0x1ef   :  { %v353_v54 = vpop.f32.mrb[6].mxu1 }
 0x1f0   :  { %v354_v55 = vadd.f32 %v353_v54, %v305_v50  ;;  %v939_v56 = vpop.f32.mrb[7].mxu1  ;;  %v357_v57 = vmax.f32 %v351_v52, 0.0  ;;  %v687_v54 = vlaneseq }
 0x1f2   :  { %v358_v58 = vmax.f32 %v354_v55, 0.0  ;;  %v688_v55 = vshrl.u32 %v687_v54, 7 }
 0x1f4   :  { %v359_v60 = vpack.c.bf16 %v358_v58, %v357_v57  ;;  %v689_v56 = vsub.s32 0, %v688_v55  ;;  %v855_v57 = vld [vmem:[%s1219_s4 + $0x7] ss:$8 sm:$0x3]  ;;  %v693_v58 = vsub.s32 1, %v688_v55 }
 0x1f6   :  { %945 = vmatmul.mubr.msk.bf16.vlgmr.msra.gmra.mrb[8].mxu1 %vm377_vm3, %v359_v60  ;;  %v694_v60 = vrot.slane %v855_v57, %v693_v58 }
 0x1f7   :  { %957 = vmatpush3.bf16.msra.mxu1 %v1012_v59  ;;  %958 = vmatprep.mubr.msk.bf16.mxu1 %vm1060_vm0, %v1059_v0  ;;  %v690_v59 = vrot.slane %v855_v57, %v689_v56 }
 0x1f8   :  { %974 = vmatprep.subr.bf16.mxu1 %v1059_v0 }
 0x1fe   :  { %959 = vmatmul.mubr.msk.bf16.vlgmr.msra.gmra.mrb[12].mxu1 %vm312_vm2, %v422_v49 }
 0x1ff   :  { %976 = vmatprep.mubr.msk.bf16.mxu1 %vm1060_vm0, %v1059_v0  ;;  %975 = vmatpush3.bf16.msra.mxu1 %v1019_v15 }
 0x2c9   :  { %v415_v63 = vpop.f32.mrb[8].mxu1 }
 0x2ca   :  { %v946_v1 = vpop.f32.mrb[9].mxu1  ;;  %v416_v3 = vadd.f32 %v415_v63, %v364_v62 }
 0x2cb   :  { %v418_v2 = vpop.f32.mrb[10].mxu1 }
 0x2cc   :  { %v419_v4 = vadd.f32 %v418_v2, %v364_v62  ;;  %v947_v5 = vpop.f32.mrb[11].mxu1 }
 0x2ce   :  { %v425_v7 = vpack.c.bf16 %v419_v4, %v416_v3 }
 0x2d0   :  { %953 = vmatmul.mubr.msk.bf16.vlgmr.msra.gmra.mrb[4].mxu0 %vm377_vm3, %v425_v7 }
 0x2d1   :  { %v529_v8 = vpop.f32.mrb[12].mxu1  ;;  %963 = vmatpush3.bf16.msra.mxu0 %v1015_v6  ;;  %970 = vmatprep.mubr.msk.bf16.mxu0 %vm1060_vm0, %v1059_v0 }
 0x2d2   :  { %v960_v9 = vpop.f32.mrb[13].mxu1  ;;  %964 = vmatprep.subr.bf16.mxu0 %v1059_v0 }
 0x2d3   :  { %v532_v10 = vpop.f32.mrb[14].mxu1 }
 0x2d4   :  { %v961_v11 = vpop.f32.mrb[15].mxu1 }
 0x2d5   :  { %965 = vmatpush3.bf16.msra.mxu0 %v1016_v12 }
 0x2d6   :  { %966 = vmatprep.subr.bf16.mxu0 %v1059_v0 }
 0x2d9   :  { %967 = vmatpush3.bf16.msra.mxu0 %v1017_v13 }
 0x2da   :  { %968 = vmatprep.subr.bf16.mxu0 %v1059_v0  ;;  %v1022_v0 = vld [vmem:[%s1218_s3 + $0x4] ss:$8 sps:$4 sm:$0xff]  }
 0x2db   :  { %740 = vmatprep.subr.bf16.mxu1 %v1022_v0 }
 0x2dd   :  { %969 = vmatpush3.bf16.msra.mxu0 %v1018_v14 }
 0x3a3   :  { %v479_v16 = vpop.f32.mrb[4].mxu0 }
 0x3a4   :  { %v530_v18 = vadd.f32 %v529_v8, %v479_v16  ;;  %v954_v19 = vpop.f32.mrb[5].mxu0 }
 0x3a5   :  { %v482_v20 = vpop.f32.mrb[6].mxu0 }
 0x3a6   :  { %v537_v21 = vadd.f32 %v536_v17, %v530_v18  ;;  %v533_v22 = vadd.f32 %v532_v10, %v482_v20  ;;  %v955_v23 = vpop.f32.mrb[7].mxu0 }
 0x3a8   :  { %v538_v24 = vadd.f32 %v536_v17, %v533_v22  ;;  %v539_v25 = vmax.f32 %v537_v21, 0.0 }
 0x3aa   :  { %v540_v26 = vmax.f32 %v538_v24, 0.0 }
 0x3ac   :  { %v541_v27 = vpack.c.bf16 %v540_v26, %v539_v25 }
 0x3ae   :  { %971 = vmatmul.mubr.msk.bf16.vlgmr.msra.gmra.mrb[8].mxu0 %vm257_vm1, %v541_v27 }
 0x481   :  { %v612_v29 = vpop.f32.mrb[8].mxu0 }
 0x482   :  { %v972_v30 = vpop.f32.mrb[9].mxu0  ;;  %v613_v32 = vadd.f32 %v612_v29, %v550_v28 }
 0x483   :  { %v615_v31 = vpop.f32.mrb[10].mxu0 }
 0x484   :  { %v616_v33 = vadd.f32 %v615_v31, %v550_v28  ;;  %v973_v34 = vpop.f32.mrb[11].mxu0 }
 0x486   :  { %v619_v36 = vpack.c.bf16 %v616_v33, %v613_v32 }
 0x488   :  { %877 = vst [vmem:[%s1221_s6] sm:$0xff] %v619_v36   ;;  %977 = vmatmul.mubr.msk.bf16.vlgmr.msra.gmra.mrb[16].mxu1 %vm312_vm2, %v619_v36 }
 0x489   :  { %741 = vmatpush1.bf16.msra.mxu1 %v1020_v35  ;;  %772 = vmatprep.mubr.bf16.mxu1 %v1061_v43 }
 0x48a   :  { %742 = vmatprep.subr.bf16.mxu1 %v1025_v37 }
 0x48d   :  { %743 = vmatpush1.bf16.msra.mxu1 %v1023_v38 }
 0x48e   :  { %744 = vmatprep.subr.bf16.mxu1 %v1028_v39 }
 0x491   :  { %745 = vmatpush1.bf16.msra.mxu1 %v1026_v40 }
 0x492   :  { %746 = vmatprep.subr.bf16.mxu1 %v1031_v41 }
 0x495   :  { %747 = vmatpush1.bf16.msra.mxu1 %v1029_v42 }
 0x55b   :  { %v666_v45 = vpop.f32.mrb[16].mxu1 }
 0x55c   :  { %v667_v46 = vadd.f32 %v666_v45, %v622_v44  ;;  %v978_v47 = vpop.f32.mrb[17].mxu1 }
 0x55d   :  { %v669_v48 = vpop.f32.mrb[18].mxu1 }
 0x55e   :  { %v670_v49 = vadd.f32 %v669_v48, %v622_v44  ;;  %v979_v50 = vpop.f32.mrb[19].mxu1  ;;  %v673_v51 = vmax.f32 %v667_v46, 0.0 }
 0x560   :  { %v674_v52 = vmax.f32 %v670_v49, 0.0 }
 0x562   :  { %v675_v53 = vpack.c.bf16 %v674_v52, %v673_v51 }
 0x564   :  { %864 = vmatmul.mubr.msk.bf16.vlgmr.msra.gmra.mrb[20].mxu1 %vm257_vm1, %v675_v53 }
 0x637   :  { %v774_v61 = vpop.f32.mrb[20].mxu1 }
 0x638   :  { %v775_v62 = vadd.f32 %v774_v61, %v690_v59  ;;  %v776_v63 = vpop.f32.mrb[21].mxu1 }
 0x639   :  { %v777_v1 = vadd.f32 %v776_v63, %v694_v60  ;;  %v778_v2 = vpop.f32.mrb[22].mxu1 }
 0x63a   :  { %v779_v3 = vadd.f32 %v778_v2, %v690_v59  ;;  %v780_v4 = vpop.f32.mrb[23].mxu1 }
 0x63b   :  { %v869_v5 = vpack.c.bf16 %v777_v1, %v775_v62  ;;  %v781_v6 = vadd.f32 %v780_v4, %v694_v60 }
 0x63d   :  { %795 = vst [vmem:[%s1220_s5] sm:$0xff] %v869_v5  ;;  %v870_v7 = vpack.c.bf16 %v781_v6, %v779_v3 }
 0x63f   :  { %796 = vst [vmem:[%s1220_s5 + $0x8] sm:$0xff] %v870_v7 }
 0x640   :  { %814 = vsyncpa [#allocation3], 1 }

</bundles_post_ra>
